<compile_context>
chip_gen: v6e
topology: v6e:2x2x1
jax: 0.10.0
libtpu: 0.0.40
codegen_flags: <defaults>
</compile_context>

<pallas_src>
import jax
import jax.numpy as jnp
from jax.experimental import pallas as pl
from jax.experimental.pallas import tpu as pltpu


def _gcn_spa_kernel(g_ref, x_ref, mask_ref, wy_ref, wx_ref, shift_ref, o_ref):
    """One grid step processes NB batch elements, fully NCHW-native.

    g_ref:     (NB, V, V*T)    bf16  g_e[n, v, u*T + t] = g[n, t, u, v]
    x_ref:     (NB, Cin, V*T)  f32   x1[n, c, v, t] flattened over (v, t)
    mask_ref:  (V*T, V*T)      bf16  frame mask (q % T == p % T), constant
    wy_ref:    (NB, Cout, Cin) bf16  w  with BN scale folded (pre-broadcast)
    wx_ref:    (NB, Cout, Cin) bf16  w1 with BN scale folded (pre-broadcast)
    shift_ref: (Cout, 1)       f32   folded BN shift
    o_ref:     (NB, Cout, V*T) f32   out[n, d, v, t] flattened over (v, t)
    """
    nb, v_dim, vt = g_ref.shape
    t_dim = vt // v_dim

    x = x_ref[...].astype(jnp.bfloat16)           # (NB, Cin, VT) bf16 MXU operand

    # Strided-block adjacency AT[b, q, p] = g_e[b, q//T, p] * (q%T == p%T),
    # built by a sublane row-repeat (broadcast + tile-aligned reshape: the
    # (V, T, VT) -> (V*T, VT) collapse keeps every (8,128) tile intact) and a
    # bf16 frame-mask multiply.  No expansion matmul, no f32 intermediate;
    # values are bit-identical to the old construction (0/1 selection is exact).
    ge = g_ref[...]                                                  # (NB, V, VT)
    at = jnp.broadcast_to(ge[:, :, None, :], (nb, v_dim, t_dim, vt))
    at = at.reshape(nb, vt, vt) * mask_ref[...][None]                # (NB, VT, VT) bf16

    # Graph aggregation: y[b, c, p] = sum_q x[b, c, q] * AT[b, q, p]
    y = jnp.einsum('bcq,bqp->bcp', x, at,
                   preferred_element_type=jnp.float32)               # (NB, Cin, VT) f32

    # Fused 1x1 convs (BN scale already folded into the weights), accumulated
    # directly in f32 -- no concat, no in-kernel weight broadcast.
    z = jnp.einsum('bdk,bkq->bdq', wy_ref[...], y.astype(jnp.bfloat16),
                   preferred_element_type=jnp.float32)               # w  on g@x
    z = z + jnp.einsum('bdk,bkq->bdq', wx_ref[...], x,
                       preferred_element_type=jnp.float32)           # w1 on x1

    # Folded BatchNorm shift + ReLU, lane-dense store.
    z = z + shift_ref[...][None, :, :]
    o_ref[...] = jnp.maximum(z, 0.0).astype(o_ref.dtype)


def _tensorcores_per_chip():
    """2 for v7x-class chips (2 TensorCores), else 1 (v5e / v6e)."""
    try:
        kind = jax.devices()[0].device_kind.lower()
    except Exception:
        return 1
    return 2 if ("v7" in kind or "7x" in kind) else 1


def _choose_batch_block(n, per_item_bytes, *, num_cores, target_bytes, max_nb=64):
    """Largest divisor of n whose per-step VMEM footprint fits target_bytes.

    Single-TC chips (v5e/v6e): just take the biggest tile (fewer grid steps =
    less ~0.35us/step pipeline overhead).  v7x (2 TCs): prefer an NB whose
    step count is a multiple of the core count so both cores stay busy.
    """
    divisors = [d for d in range(1, n + 1) if n % d == 0]
    ok = [d for d in divisors if d <= max_nb and d * per_item_bytes <= target_bytes]
    if not ok:
        return 1
    if num_cores >= 2:
        even = [d for d in ok if (n // d) % num_cores == 0]
        if even:
            return max(even)
    return max(ok)


def gcn_spa_forward(x1, g, w, w1, gamma, beta, running_mean, running_var,
                    eps=1e-5, out_dtype=jnp.float32):
    """x1: (N, Cin, V, T) NCHW; g: (N, T, V, V). Returns (N, Cout, V, T)."""
    n, cin, v_dim, t_dim = x1.shape
    cout = w.shape[0]
    vt = v_dim * t_dim

    # ---- cheap wrapper glue (no large-tensor transposes / casts) ----
    x_flat = x1.reshape(n, cin, vt)                                  # free view
    # g_e[n, v, u*T + t] = g[n, t, u, v]   (g is tiny vs x/out, so this is cheap)
    g_e = jnp.transpose(g, (0, 3, 2, 1)).reshape(n, v_dim, vt).astype(jnp.bfloat16)

    # Frame mask (q % T == p % T): constant (VT, VT) bf16 input, DMA'd once.
    qt = jnp.arange(vt, dtype=jnp.int32) % t_dim
    mask = (qt[:, None] == qt[None, :]).astype(jnp.bfloat16)

    # Fold eval-mode BN into the conv weights and a per-channel shift.
    scale = gamma / jnp.sqrt(running_var + eps)
    wy = (w.reshape(cout, cin) * scale[:, None]).astype(jnp.bfloat16)
    wx = (w1.reshape(cout, cin) * scale[:, None]).astype(jnp.bfloat16)
    shift = (beta - running_mean * scale).reshape(cout, 1).astype(jnp.float32)

    # Per-item VMEM budget: double-buffered I/O tiles + in-kernel intermediates.
    x_bpe = jnp.dtype(x_flat.dtype).itemsize
    o_bpe = jnp.dtype(out_dtype).itemsize
    io = cin * vt * x_bpe + v_dim * vt * 2 + cout * vt * o_bpe       # x + g + out
    inter = (2 * vt * vt * 2               # repeated g + masked AT (bf16)
             + cin * vt * (2 + 4 + 2)      # x bf16, y f32, y bf16
             + cout * vt * 4)              # z f32
    per_item = 2 * io + inter

    num_cores = _tensorcores_per_chip()
    nb = _choose_batch_block(n, per_item, num_cores=num_cores,
                             target_bytes=4 << 20)
    grid = (n // nb,)

    # Pre-broadcast the (tiny) folded weights so the kernel's conv matmuls are
    # plain batched dot_generals with no in-kernel broadcast or concat.
    wy_b = jnp.broadcast_to(wy[None], (nb, cout, cin))
    wx_b = jnp.broadcast_to(wx[None], (nb, cout, cin))

    # Explicit VMEM limit (scoped defaults: 16 MiB v5e / 32 MiB v6e,v7x).
    const_bytes = 2 * vt * vt * 2 + 4 * nb * cout * 128 * 2 + 2 * cout * 128 * 4
    vmem_needed = nb * per_item + const_bytes + (4 << 20)
    vmem_cap = (48 << 20) if num_cores >= 2 else (112 << 20)
    vmem_limit = int(min(vmem_cap, max(vmem_needed, 32 << 20)))

    out_flat = pl.pallas_call(
        _gcn_spa_kernel,
        out_shape=jax.ShapeDtypeStruct((n, cout, vt), out_dtype),
        grid_spec=pltpu.PrefetchScalarGridSpec(
            num_scalar_prefetch=0,
            grid=grid,
            in_specs=[
                pl.BlockSpec((nb, v_dim, vt), lambda i: (i, 0, 0)),   # g_e
                pl.BlockSpec((nb, cin, vt), lambda i: (i, 0, 0)),     # x
                pl.BlockSpec((vt, vt), lambda i: (0, 0)),             # frame mask
                pl.BlockSpec((nb, cout, cin), lambda i: (0, 0, 0)),   # w  (BN-scaled)
                pl.BlockSpec((nb, cout, cin), lambda i: (0, 0, 0)),   # w1 (BN-scaled)
                pl.BlockSpec((cout, 1), lambda i: (0, 0)),            # BN shift
            ],
            out_specs=pl.BlockSpec((nb, cout, vt), lambda i: (i, 0, 0)),
        ),
        compiler_params=pltpu.CompilerParams(
            dimension_semantics=("parallel",),
            vmem_limit_bytes=vmem_limit),
    )(g_e, x_flat, mask, wy_b, wx_b, shift)

    # Back to the PyTorch NCHW layout — a contiguous (free) reshape, no transpose.
    return out_flat.reshape(n, cout, v_dim, t_dim)


def gcn_spa_reference(x1, g, w, w1, gamma, beta, mean, var, eps=1e-5):
    """Pure-JAX transliteration of the PyTorch forward (eval-mode BN), f32."""
    N, Cin, V, T = x1.shape
    Cout = w.shape[0]
    x = jnp.transpose(x1, (0, 3, 2, 1))                      # (N, T, V, Cin)
    x = jnp.einsum('ntuv,ntvc->ntuc', g, x)                  # g.matmul(x)
    x = jnp.transpose(x, (0, 3, 2, 1))                       # (N, Cin, V, T)
    xw = jnp.einsum('oc,ncvt->novt', w.reshape(Cout, Cin), x)
    x1w = jnp.einsum('oc,ncvt->novt', w1.reshape(Cout, Cin), x1)
    y = xw + x1w
    y = ((y - mean[None, :, None, None])
         / jnp.sqrt(var[None, :, None, None] + eps)
         * gamma[None, :, None, None] + beta[None, :, None, None])
    return jnp.maximum(y, 0.0)


if __name__ == "__main__":
    key = jax.random.PRNGKey(0)
    N, Cin, Cout, V, T = 2, 16, 32, 16, 8

    k = jax.random.split(key, 8)
    # inputs
    x1 = jax.random.normal(k[0], (N, Cin, V, T), dtype=jnp.float32)
    g_logits = jax.random.normal(k[1], (N, T, V, V), dtype=jnp.float32)
    g = jax.nn.softmax(g_logits, axis=-1)                     # SGN-style adjacency

    # deterministic parameter init (shapes match nn.Conv2d(..., kernel_size=1))
    w = 0.1 * jax.random.normal(k[2], (Cout, Cin, 1, 1), dtype=jnp.float32)
    w1 = 0.1 * jax.random.normal(k[3], (Cout, Cin, 1, 1), dtype=jnp.float32)
    gamma = 1.0 + 0.1 * jax.random.normal(k[4], (Cout,), dtype=jnp.float32)
    beta = 0.05 * jax.random.normal(k[5], (Cout,), dtype=jnp.float32)
    running_mean = 0.1 * jax.random.normal(k[6], (Cout,), dtype=jnp.float32)
    running_var = 0.5 + jnp.abs(jax.random.normal(k[7], (Cout,),
                                                  dtype=jnp.float32)) * 0.5

    out = gcn_spa_forward(x1, g, w, w1, gamma, beta, running_mean, running_var)
    out = jax.block_until_ready(out)

    ref = gcn_spa_reference(x1, g, w, w1, gamma, beta, running_mean,
                            running_var)
    ref = jax.block_until_ready(ref)

    assert out.shape == (N, Cout, V, T), out.shape
    # bf16 MXU operands -> relaxed tolerance vs the f32 reference.
    assert jnp.allclose(out, ref, rtol=2e-2, atol=2e-2), (
        float(jnp.max(jnp.abs(out - ref))))
    print("KERNEL_OK")
</pallas_src>

<mosaic_0001>
module attributes {stable_mosaic.version = 11 : i64} {
  func.func @_gcn_spa_kernel(%arg0: i32, %arg1: memref<2x16x128xbf16, #tpu.memory_space<vmem>>, %arg2: memref<2x16x128xf32, #tpu.memory_space<vmem>>, %arg3: memref<128x128xbf16, #tpu.memory_space<vmem>>, %arg4: memref<2x32x16xbf16, #tpu.memory_space<vmem>>, %arg5: memref<2x32x16xbf16, #tpu.memory_space<vmem>>, %arg6: memref<32x1xf32, #tpu.memory_space<vmem>>, %arg7: memref<2x32x128xf32, #tpu.memory_space<vmem>>) attributes {dimension_semantics = [#tpu.dimension_semantics<parallel>], iteration_bounds = array<i64: 1>, scalar_prefetch = 0 : i64, scratch_operands = 0 : i64, tpu.core_type = #tpu.core_type<tc>, window_params = [{transform_indices = @transform_0, window_bounds = array<i64: 2, 16, 128>}, {transform_indices = @transform_1, window_bounds = array<i64: 2, 16, 128>}, {pipeline_mode = #tpu.pipeline_mode<synchronous>, transform_indices = @transform_2, window_bounds = array<i64: 128, 128>}, {pipeline_mode = #tpu.pipeline_mode<synchronous>, transform_indices = @transform_3, window_bounds = array<i64: 2, 32, 16>}, {pipeline_mode = #tpu.pipeline_mode<synchronous>, transform_indices = @transform_4, window_bounds = array<i64: 2, 32, 16>}, {pipeline_mode = #tpu.pipeline_mode<synchronous>, transform_indices = @transform_5, window_bounds = array<i64: 32, 1>}, {transform_indices = @transform_6, window_bounds = array<i64: 2, 32, 128>}]} {
    %c0 = arith.constant 0 : index
    %c0_0 = arith.constant 0 : index
    %c0_1 = arith.constant 0 : index
    %0 = vector.load %arg2[%c0, %c0_0, %c0_1] : memref<2x16x128xf32, #tpu.memory_space<vmem>>, vector<2x16x128xf32>
    %1 = arith.truncf %0 : vector<2x16x128xf32> to vector<2x16x128xbf16>
    %c0_2 = arith.constant 0 : index
    %c0_3 = arith.constant 0 : index
    %c0_4 = arith.constant 0 : index
    %2 = vector.load %arg1[%c0_2, %c0_3, %c0_4] : memref<2x16x128xbf16, #tpu.memory_space<vmem>>, vector<2x16x128xbf16>
    %3 = vector.shape_cast %2 : vector<2x16x128xbf16> to vector<2x16x1x128xbf16>
    %4 = vector.shape_cast %3 : vector<2x16x1x128xbf16> to vector<2x16x1x128xbf16>
    %5 = vector.broadcast %4 : vector<2x16x1x128xbf16> to vector<2x16x8x128xbf16>
    %6 = vector.shape_cast %5 : vector<2x16x8x128xbf16> to vector<2x128x128xbf16>
    %c0_5 = arith.constant 0 : index
    %c0_6 = arith.constant 0 : index
    %7 = vector.load %arg3[%c0_5, %c0_6] : memref<128x128xbf16, #tpu.memory_space<vmem>>, vector<128x128xbf16>
    %8 = vector.shape_cast %7 : vector<128x128xbf16> to vector<1x128x128xbf16>
    %9 = vector.broadcast %8 : vector<1x128x128xbf16> to vector<2x128x128xbf16>
    %10 = arith.mulf %6, %9 : vector<2x128x128xbf16>
    "tpu.trace_start"() <{level = 10 : i32, message = "bcq,bqp->bcp"}> : () -> ()
    %cst = arith.constant dense<0.000000e+00> : vector<2x16x128xf32>
    %11 = tpu.matmul %1, %10, %cst {dimension_numbers = #tpu.dot_dimension_numbers<[2], [1], [1], [2], [0, 0, 0, 1, 1, 2], [0], [0]>} : vector<2x16x128xbf16>, vector<2x128x128xbf16>, vector<2x16x128xf32> -> vector<2x16x128xf32>
    "tpu.trace_stop"() : () -> ()
    %c0_7 = arith.constant 0 : index
    %c0_8 = arith.constant 0 : index
    %c0_9 = arith.constant 0 : index
    %12 = vector.load %arg4[%c0_7, %c0_8, %c0_9] : memref<2x32x16xbf16, #tpu.memory_space<vmem>>, vector<2x32x16xbf16>
    %13 = arith.truncf %11 : vector<2x16x128xf32> to vector<2x16x128xbf16>
    "tpu.trace_start"() <{level = 10 : i32, message = "bdk,bkq->bdq"}> : () -> ()
    %cst_10 = arith.constant dense<0.000000e+00> : vector<2x32x128xf32>
    %14 = tpu.matmul %12, %13, %cst_10 {dimension_numbers = #tpu.dot_dimension_numbers<[2], [1], [1], [2], [0, 0, 0, 1, 1, 2], [0], [0]>} : vector<2x32x16xbf16>, vector<2x16x128xbf16>, vector<2x32x128xf32> -> vector<2x32x128xf32>
    "tpu.trace_stop"() : () -> ()
    %c0_11 = arith.constant 0 : index
    %c0_12 = arith.constant 0 : index
    %c0_13 = arith.constant 0 : index
    %15 = vector.load %arg5[%c0_11, %c0_12, %c0_13] : memref<2x32x16xbf16, #tpu.memory_space<vmem>>, vector<2x32x16xbf16>
    "tpu.trace_start"() <{level = 10 : i32, message = "bdk,bkq->bdq"}> : () -> ()
    %cst_14 = arith.constant dense<0.000000e+00> : vector<2x32x128xf32>
    %16 = tpu.matmul %15, %1, %cst_14 {dimension_numbers = #tpu.dot_dimension_numbers<[2], [1], [1], [2], [0, 0, 0, 1, 1, 2], [0], [0]>} : vector<2x32x16xbf16>, vector<2x16x128xbf16>, vector<2x32x128xf32> -> vector<2x32x128xf32>
    "tpu.trace_stop"() : () -> ()
    %17 = arith.addf %14, %16 : vector<2x32x128xf32>
    %c0_15 = arith.constant 0 : index
    %c0_16 = arith.constant 0 : index
    %18 = vector.load %arg6[%c0_15, %c0_16] : memref<32x1xf32, #tpu.memory_space<vmem>>, vector<32x1xf32>
    %19 = vector.shape_cast %18 : vector<32x1xf32> to vector<1x32x1xf32>
    %20 = vector.broadcast %19 : vector<1x32x1xf32> to vector<2x32x128xf32>
    %21 = arith.addf %17, %20 : vector<2x32x128xf32>
    %cst_17 = arith.constant 0.000000e+00 : f32
    %22 = vector.broadcast %cst_17 : f32 to vector<2x32x128xf32>
    %23 = arith.maximumf %21, %22 : vector<2x32x128xf32>
    %c0_18 = arith.constant 0 : index
    %c0_19 = arith.constant 0 : index
    %c0_20 = arith.constant 0 : index
    %24 = vector.load %arg7[%c0_18, %c0_19, %c0_20] : memref<2x32x128xf32, #tpu.memory_space<vmem>>, vector<2x32x128xf32>
    tpu.vector_store %arg7[%c0_18, %c0_19, %c0_20], %23 {strides = array<i32>} : memref<2x32x128xf32, #tpu.memory_space<vmem>>, vector<2x32x128xf32>,
    return
  }
  func.func @transform_0(%arg0: i32) -> (i32, i32, i32) {
    %c0_i32 = arith.constant 0 : i32
    %c0_i32_0 = arith.constant 0 : i32
    %c0_i32_1 = arith.constant 0 : i32
    return %arg0, %c0_i32, %c0_i32_0 : i32, i32, i32
  }
  func.func @transform_1(%arg0: i32) -> (i32, i32, i32) {
    %c0_i32 = arith.constant 0 : i32
    %c0_i32_0 = arith.constant 0 : i32
    %c0_i32_1 = arith.constant 0 : i32
    return %arg0, %c0_i32, %c0_i32_0 : i32, i32, i32
  }
  func.func @transform_2(%arg0: i32) -> (i32, i32) {
    %c0_i32 = arith.constant 0 : i32
    %c0_i32_0 = arith.constant 0 : i32
    %c0_i32_1 = arith.constant 0 : i32
    return %c0_i32, %c0_i32_0 : i32, i32
  }
  func.func @transform_3(%arg0: i32) -> (i32, i32, i32) {
    %c0_i32 = arith.constant 0 : i32
    %c0_i32_0 = arith.constant 0 : i32
    %c0_i32_1 = arith.constant 0 : i32
    %c0_i32_2 = arith.constant 0 : i32
    return %c0_i32, %c0_i32_0, %c0_i32_1 : i32, i32, i32
  }
  func.func @transform_4(%arg0: i32) -> (i32, i32, i32) {
    %c0_i32 = arith.constant 0 : i32
    %c0_i32_0 = arith.constant 0 : i32
    %c0_i32_1 = arith.constant 0 : i32
    %c0_i32_2 = arith.constant 0 : i32
    return %c0_i32, %c0_i32_0, %c0_i32_1 : i32, i32, i32
  }
  func.func @transform_5(%arg0: i32) -> (i32, i32) {
    %c0_i32 = arith.constant 0 : i32
    %c0_i32_0 = arith.constant 0 : i32
    %c0_i32_1 = arith.constant 0 : i32
    return %c0_i32, %c0_i32_0 : i32, i32
  }
  func.func @transform_6(%arg0: i32) -> (i32, i32, i32) {
    %c0_i32 = arith.constant 0 : i32
    %c0_i32_0 = arith.constant 0 : i32
    %c0_i32_1 = arith.constant 0 : i32
    return %arg0, %c0_i32, %c0_i32_0 : i32, i32, i32
  }
}

</mosaic_0001>

<bundles_post_ra>
// kernel: tpu_custom_call.1
= control target key start
LH: loop header
LB: loop body
LE: loop exit
PB: predicated region body
PF: predicated region fallthrough
CT: control target
= control target key end

     0   :  { %v50_v0 = vlaneseq  ;;  %v1305_v1 = vmov 0.0   ;;  %v1306_v3 = vmov 1966171168   ;;  %vm1307_vm0 = vmmov 0   ;;  %s1636_s0 = inlined_call_operand.vmem [shape: bf16[2,16,128], index: 0, kind: input, shape index: {}]   ;;  %s1637_s1 = inlined_call_operand.vmem [shape: f32[2,16,128], index: 1, kind: input, shape index: {}]   ;;  %s1638_s2 = inlined_call_operand.vmem [shape: bf16[128,128], index: 2, kind: input, shape index: {}]   ;;  %s1639_s3 = inlined_call_operand.vmem [shape: bf16[2,32,16], index: 3, kind: input, shape index: {}]   ;;  %s1640_s4 = inlined_call_operand.vmem [shape: bf16[2,32,16], index: 4, kind: input, shape index: {}]   ;;  %s1641_s5 = inlined_call_operand.vmem [shape: f32[32,1], index: 5, kind: input, shape index: {}]   ;;  %s1642_s6 = inlined_call_operand.hbm [shape: f32[2,32,128], index: 6, kind: output, shape index: {}]  }
   0x1   :  { %1202 = vmatprep.subr.bf16.mxu0 %v1305_v1  ;;  %1222 = vmatprep.subr.bf16.mxu1 %v1305_v1  ;;  %v1121_v2 = vld.sshfl [vmem:[%s1636_s0 + $0x4] sm:$0x33 pattern:$0x75316420]  ;;  %v48_v4 = vunpack.c.l.s4 %v1306_v3 }
   0x2   :  { %v51_v5 = vshrl.u32 %v50_v0, 7  ;;  %v1123_v6 = vld.sshfl [vmem:[%s1636_s0 + $0xc] sm:$0x33 pattern:$0x75316420]  ;;  %1218 = vmatprep.mubr.msk.bf16.mxu0 %vm1307_vm0, %v1305_v1  ;;  %1238 = vmatprep.mubr.msk.bf16.mxu1 %vm1307_vm0, %v1305_v1  ;;  %v70_v8 = vcombine.high %v1121_v2, %v1121_v2 }
   0x3   :  { %v49_v7 = vunpack.c.0.s8 %v48_v4  ;;  %v118_v9 = vcombine.high %v1123_v6, %v1123_v6  ;;  %v1120_v10 = vld.sshfl [vmem:[%s1636_s0] sm:$0x33 pattern:$0x75316420] }
   0x4   :  { %v46_v12 = vcombine.high %v1120_v10, %v1120_v10  ;;  %v1362_v13 = vsub.s32 0, %v51_v5  ;;  %v1367_v14 = vld.sshfl [vmem:[%s1636_s0 + $0x8] sm:$0x33 pattern:$0x75316420] }
   0x5   :  { %v1360_v11 = vsub.s32 %v49_v7, %v51_v5  ;;  %v94_v20 = vcombine.high %v1367_v14, %v1367_v14 }
   0x7   :  { %v1370_v15 = vrot.slane %v70_v8, %v1360_v11  ;;  %v1373_v16 = vrot.slane %v118_v9, %v1360_v11  ;;  %v1376_v17 = vrot.slane %v1121_v2, %v1360_v11  ;;  %v1379_v18 = vrot.slane %v1123_v6, %v1360_v11 }
   0x8   :  { %v1382_v19 = vrot.slane %v46_v12, %v1360_v11  ;;  %v1387_v21 = vrot.slane %v1120_v10, %v1360_v11  ;;  %v1391_v22 = vrot.slane %v1367_v14, %v1360_v11 }
   0x9   :  { %v86_v23 = vcombine.high %v1370_v15, %v1370_v15  ;;  %v134_v24 = vcombine.high %v1373_v16, %v1373_v16  ;;  %v85_v25 = vcombine.high %v1376_v17, %v1376_v17  ;;  %v133_v26 = vcombine.high %v1379_v18, %v1379_v18 }
   0xa   :  { %v146_v27 = vunpack.i.h.s16 %v1370_v15  ;;  %v1129_v28 = vpack.i.b16 %v1370_v15, %v1370_v15  ;;  %v162_v29 = vunpack.i.h.s16 %v1373_v16  ;;  %v1137_v30 = vpack.i.b16 %v1373_v16, %v1373_v16 }
   0xb   :  { %v150_v31 = vunpack.i.h.s16 %v86_v23  ;;  %v1131_v32 = vpack.i.b16 %v86_v23, %v86_v23  ;;  %v166_v33 = vunpack.i.h.s16 %v134_v24  ;;  %v1139_v34 = vpack.i.b16 %v134_v24, %v134_v24 }
   0xc   :  { %v148_v35 = vunpack.i.h.s16 %v85_v25  ;;  %v1130_v36 = vpack.i.b16 %v85_v25, %v85_v25  ;;  %v164_v37 = vunpack.i.h.s16 %v133_v26  ;;  %v1138_v38 = vpack.i.b16 %v133_v26, %v133_v26 }
   0xd   :  { %v182_v39 = vpack.i.b16 %v150_v31, %v150_v31  ;;  %v258_v40 = vrot.slane %v1131_v32, %v1362_v13  ;;  %v198_v41 = vpack.i.b16 %v166_v33, %v166_v33  ;;  %v322_v42 = vrot.slane %v1139_v34, %v1362_v13 }
   0xe   :  { %v180_v43 = vpack.i.b16 %v148_v35, %v148_v35  ;;  %v250_v44 = vrot.slane %v1130_v36, %v1362_v13  ;;  %v196_v45 = vpack.i.b16 %v164_v37, %v164_v37  ;;  %v314_v46 = vrot.slane %v1138_v38, %v1362_v13 }
   0xf   :  { %11 = vsyncpa [#allocation3], 0  ;;  %v262_v47 = vrot.slane %v182_v39, %v1362_v13  ;;  %v426_v48 = vpack.i.b16 %v258_v40, %v258_v40  ;;  %v326_v49 = vrot.slane %v198_v41, %v1362_v13  ;;  %v538_v50 = vpack.i.b16 %v322_v42, %v322_v42  ;;  %v565_v51 = vld [vmem:[%s1638_s2 + $0x38] sm:$0xf]  ;;  %v563_v60 = vld [vmem:[%s1638_s2 + $0x30] sm:$0xf] }
  0x10   :  { %v254_v52 = vrot.slane %v180_v43, %v1362_v13  ;;  %v412_v53 = vpack.i.b16 %v250_v44, %v250_v44  ;;  %v318_v54 = vrot.slane %v196_v45, %v1362_v13  ;;  %v524_v55 = vpack.i.b16 %v314_v46, %v314_v46  ;;  %v566_v61 = vld [vmem:[%s1638_s2 + $0x3c] sm:$0xf]  ;;  %v564_v7 = vld [vmem:[%s1638_s2 + $0x34] sm:$0xf]  ;;  %v561_v39 = vld [vmem:[%s1638_s2 + $0x28] sm:$0xf] }
  0x11   :  { %v431_v56 = vrot.slane %v426_v48, %v1362_v13  ;;  %v433_v57 = vpack.i.b16 %v262_v47, %v262_v47  ;;  %v543_v58 = vrot.slane %v538_v50, %v1362_v13  ;;  %v545_v59 = vpack.i.b16 %v326_v49, %v326_v49  ;;  %v562_v42 = vld [vmem:[%s1638_s2 + $0x2c] sm:$0xf] }
  0x12   :  { %v417_v62 = vrot.slane %v412_v53, %v1362_v13  ;;  %v419_v63 = vpack.i.b16 %v254_v52, %v254_v52  ;;  %v529_v0 = vrot.slane %v524_v55, %v1362_v13  ;;  %v531_v2 = vpack.i.b16 %v318_v54, %v318_v54 }
  0x13   :  { %v438_v3 = vrot.slane %v433_v57, %v1362_v13  ;;  %v581_v4 = vmul.bf16 %v565_v51, %v431_v56  ;;  %v550_v5 = vrot.slane %v545_v59, %v1362_v13  ;;  %v597_v6 = vmul.bf16 %v565_v51, %v543_v58  ;;  %v559_v58 = vld [vmem:[%s1638_s2 + $0x20] sm:$0xf] }
  0x14   :  { %v424_v8 = vrot.slane %v419_v63, %v1362_v13  ;;  %v579_v9 = vmul.bf16 %v563_v60, %v417_v62  ;;  %v536_v10 = vrot.slane %v531_v2, %v1362_v13  ;;  %v595_v12 = vmul.bf16 %v563_v60, %v529_v0 }
  0x15   :  { %v582_v15 = vmul.bf16 %v566_v61, %v438_v3  ;;  %v598_v16 = vmul.bf16 %v566_v61, %v550_v5  ;;  %v178_v23 = vpack.i.b16 %v146_v27, %v146_v27  ;;  %v242_v24 = vrot.slane %v1129_v28, %v1362_v13 }
  0x16   :  { %v580_v25 = vmul.bf16 %v564_v7, %v424_v8  ;;  %v596_v26 = vmul.bf16 %v564_v7, %v536_v10  ;;  %v194_v31 = vpack.i.b16 %v162_v29, %v162_v29  ;;  %v306_v32 = vrot.slane %v1137_v30, %v1362_v13 }
  0x17   :  { %v1147_v33 = vcombine.low %v581_v4, %v582_v15  ;;  %v1155_v34 = vcombine.low %v597_v6, %v598_v16  ;;  %v246_v35 = vrot.slane %v178_v23, %v1362_v13  ;;  %v398_v36 = vpack.i.b16 %v242_v24, %v242_v24  ;;  %v560_v4 = vld [vmem:[%s1638_s2 + $0x24] sm:$0xf] }
  0x18   :  { %v1146_v37 = vcombine.low %v579_v9, %v580_v25  ;;  %v1154_v38 = vcombine.low %v595_v12, %v596_v26  ;;  %v310_v27 = vrot.slane %v194_v31, %v1362_v13  ;;  %v510_v40 = vpack.i.b16 %v306_v32, %v306_v32 }
  0x19   :  { %1203 = vmatpush3.bf16.msra.mxu0 %v1147_v33  ;;  %1223 = vmatpush3.bf16.msra.mxu1 %v1155_v34  ;;  %v403_v28 = vrot.slane %v398_v36, %v1362_v13  ;;  %v405_v29 = vpack.i.b16 %v246_v35, %v246_v35  ;;  %v144_v30 = vunpack.i.h.s16 %v1376_v17  ;;  %v1128_v41 = vpack.i.b16 %v1376_v17, %v1376_v17 }
  0x1a   :  { %1204 = vmatprep.subr.bf16.mxu0 %v1305_v1  ;;  %1224 = vmatprep.subr.bf16.mxu1 %v1305_v1  ;;  %v515_v43 = vrot.slane %v510_v40, %v1362_v13  ;;  %v517_v44 = vpack.i.b16 %v310_v27, %v310_v27  ;;  %v160_v45 = vunpack.i.h.s16 %v1379_v18  ;;  %v1136_v46 = vpack.i.b16 %v1379_v18, %v1379_v18 }
  0x1b   :  { %v410_v47 = vrot.slane %v405_v29, %v1362_v13  ;;  %v577_v48 = vmul.bf16 %v561_v39, %v403_v28  ;;  %v176_v17 = vpack.i.b16 %v144_v30, %v144_v30  ;;  %v234_v49 = vrot.slane %v1128_v41, %v1362_v13 }
  0x1c   :  { %v522_v50 = vrot.slane %v517_v44, %v1362_v13  ;;  %v593_v51 = vmul.bf16 %v561_v39, %v515_v43  ;;  %v192_v52 = vpack.i.b16 %v160_v45, %v160_v45  ;;  %v298_v53 = vrot.slane %v1136_v46, %v1362_v13  ;;  %v557_v39 = vld [vmem:[%s1638_s2 + $0x18] sm:$0xf]  ;;  %v558_v43 = vld [vmem:[%s1638_s2 + $0x1c] sm:$0xf] }
  0x1d   :  { %1205 = vmatpush3.bf16.msra.mxu0 %v1146_v37  ;;  %1225 = vmatpush3.bf16.msra.mxu1 %v1154_v38  ;;  %v578_v54 = vmul.bf16 %v562_v42, %v410_v47  ;;  %v238_v55 = vrot.slane %v176_v17, %v1362_v13  ;;  %v384_v56 = vpack.i.b16 %v234_v49, %v234_v49  ;;  %v138_v18 = vunpack.i.h.s16 %v1382_v19 }
  0x1e   :  { %1206 = vmatprep.subr.bf16.mxu0 %v1305_v1  ;;  %1226 = vmatprep.subr.bf16.mxu1 %v1305_v1  ;;  %v594_v57 = vmul.bf16 %v562_v42, %v522_v50  ;;  %v302_v59 = vrot.slane %v192_v52, %v1362_v13  ;;  %v496_v60 = vpack.i.b16 %v298_v53, %v298_v53  ;;  %v136_v61 = vunpack.i.h.s16 %v1387_v21 }
  0x1f   :  { %v1145_v62 = vcombine.low %v577_v48, %v578_v54  ;;  %v389_v63 = vrot.slane %v384_v56, %v1362_v13  ;;  %v391_v0 = vpack.i.b16 %v238_v55, %v238_v55  ;;  %v62_v2 = vcombine.high %v1382_v19, %v1382_v19 }
  0x20   :  { %v1153_v3 = vcombine.low %v593_v51, %v594_v57  ;;  %v501_v5 = vrot.slane %v496_v60, %v1362_v13  ;;  %v503_v6 = vpack.i.b16 %v302_v59, %v302_v59  ;;  %v1479_v7 = vrot.slane %v94_v20, %v1360_v11  ;;  %v555_v57 = vld [vmem:[%s1638_s2 + $0x10] sm:$0xf] }
  0x21   :  { %1207 = vmatpush3.bf16.msra.mxu0 %v1145_v62  ;;  %v396_v8 = vrot.slane %v391_v0, %v1362_v13  ;;  %v575_v9 = vmul.bf16 %v559_v58, %v389_v63  ;;  %v142_v10 = vunpack.i.h.s16 %v62_v2  ;;  %v1127_v12 = vpack.i.b16 %v62_v2, %v62_v2  ;;  %v556_v0 = vld [vmem:[%s1638_s2 + $0x14] sm:$0xf] }
  0x22   :  { %1227 = vmatpush3.bf16.msra.mxu1 %v1153_v3  ;;  %1208 = vmatprep.subr.bf16.mxu0 %v1305_v1  ;;  %v508_v15 = vrot.slane %v503_v6, %v1362_v13  ;;  %v591_v16 = vmul.bf16 %v559_v58, %v501_v5  ;;  %v110_v23 = vcombine.high %v1479_v7, %v1479_v7  ;;  %v154_v24 = vunpack.i.h.s16 %v1479_v7 }
  0x23   :  { %1228 = vmatprep.subr.bf16.mxu1 %v1305_v1  ;;  %v576_v11 = vmul.bf16 %v560_v4, %v396_v8  ;;  %v174_v14 = vpack.i.b16 %v142_v10, %v142_v10  ;;  %v226_v20 = vrot.slane %v1127_v12, %v1362_v13  ;;  %v61_v25 = vcombine.high %v1387_v21, %v1387_v21 }
  0x24   :  { %v592_v26 = vmul.bf16 %v560_v4, %v508_v15  ;;  %v158_v31 = vunpack.i.h.s16 %v110_v23  ;;  %v1135_v32 = vpack.i.b16 %v110_v23, %v110_v23  ;;  %v109_v33 = vcombine.high %v1391_v22, %v1391_v22 }
  0x25   :  { %v1144_v34 = vcombine.low %v575_v9, %v576_v11  ;;  %v230_v35 = vrot.slane %v174_v14, %v1362_v13  ;;  %v370_v36 = vpack.i.b16 %v226_v20, %v226_v20  ;;  %v140_v37 = vunpack.i.h.s16 %v61_v25 }
  0x26   :  { %v1152_v38 = vcombine.low %v591_v16, %v592_v26  ;;  %v190_v27 = vpack.i.b16 %v158_v31, %v158_v31  ;;  %v290_v40 = vrot.slane %v1135_v32, %v1362_v13  ;;  %v1126_v28 = vpack.i.b16 %v61_v25, %v61_v25  ;;  %v553_v32 = vld [vmem:[%s1638_s2 + $0x8] sm:$0xf] }
  0x27   :  { %1209 = vmatpush3.bf16.msra.mxu0 %v1144_v34  ;;  %v375_v29 = vrot.slane %v370_v36, %v1362_v13  ;;  %v377_v30 = vpack.i.b16 %v230_v35, %v230_v35  ;;  %v172_v41 = vpack.i.b16 %v140_v37, %v140_v37  ;;  %v156_v42 = vunpack.i.h.s16 %v109_v33  ;;  %v554_v36 = vld [vmem:[%s1638_s2 + $0xc] sm:$0xf] }
  0x28   :  { %1229 = vmatpush3.bf16.msra.mxu1 %v1152_v38  ;;  %1210 = vmatprep.subr.bf16.mxu0 %v1305_v1  ;;  %v294_v44 = vrot.slane %v190_v27, %v1362_v13  ;;  %v482_v45 = vpack.i.b16 %v290_v40, %v290_v40  ;;  %v218_v46 = vrot.slane %v1126_v28, %v1362_v13  ;;  %v152_v47 = vunpack.i.h.s16 %v1391_v22 }
  0x29   :  { %1230 = vmatprep.subr.bf16.mxu1 %v1305_v1  ;;  %v382_v48 = vrot.slane %v377_v30, %v1362_v13  ;;  %v573_v17 = vmul.bf16 %v557_v39, %v375_v29  ;;  %v222_v49 = vrot.slane %v172_v41, %v1362_v13  ;;  %v1134_v50 = vpack.i.b16 %v109_v33, %v109_v33 }
  0x2a   :  { %v487_v51 = vrot.slane %v482_v45, %v1362_v13  ;;  %v489_v52 = vpack.i.b16 %v294_v44, %v294_v44  ;;  %v356_v53 = vpack.i.b16 %v218_v46, %v218_v46  ;;  %v188_v54 = vpack.i.b16 %v156_v42, %v156_v42 }
  0x2b   :  { %v574_v55 = vmul.bf16 %v558_v43, %v382_v48  ;;  %v363_v56 = vpack.i.b16 %v222_v49, %v222_v49  ;;  %v282_v58 = vrot.slane %v1134_v50, %v1362_v13  ;;  %v1125_v59 = vpack.i.b16 %v1382_v19, %v1382_v19 }
  0x2c   :  { %v494_v60 = vrot.slane %v489_v52, %v1362_v13  ;;  %v589_v62 = vmul.bf16 %v557_v39, %v487_v51  ;;  %v361_v63 = vrot.slane %v356_v53, %v1362_v13  ;;  %v286_v2 = vrot.slane %v188_v54, %v1362_v13 }
  0x2d   :  { %v1143_v3 = vcombine.low %v573_v17, %v574_v55  ;;  %v368_v4 = vrot.slane %v363_v56, %v1362_v13  ;;  %v468_v5 = vpack.i.b16 %v282_v58, %v282_v58  ;;  %v170_v6 = vpack.i.b16 %v138_v18, %v138_v18  ;;  %v551_v17 = vld [vmem:[%s1638_s2] sm:$0xf] }
  0x2e   :  { %v590_v8 = vmul.bf16 %v558_v43, %v494_v60  ;;  %v571_v9 = vmul.bf16 %v555_v57, %v361_v63  ;;  %v475_v10 = vpack.i.b16 %v286_v2, %v286_v2  ;;  %v210_v12 = vrot.slane %v1125_v59, %v1362_v13  ;;  %v25_v59 = vld [vmem:[%s1637_s1] sm:$0xff]  ;;  %v26_v60 = vld [vmem:[%s1637_s1 + $0x8] sm:$0xff] }
  0x2f   :  { %1211 = vmatpush3.bf16.msra.mxu0 %v1143_v3  ;;  %v572_v15 = vmul.bf16 %v556_v0, %v368_v4  ;;  %v473_v16 = vrot.slane %v468_v5, %v1362_v13  ;;  %v214_v23 = vrot.slane %v170_v6, %v1362_v13  ;;  %v1133_v11 = vpack.i.b16 %v1479_v7, %v1479_v7  ;;  %v27_v4 = vld [vmem:[%s1637_s1 + $0x10] sm:$0xff]  ;;  %v28_v5 = vld [vmem:[%s1637_s1 + $0x18] sm:$0xff] }
  0x30   :  { %v1151_v14 = vcombine.low %v589_v62, %v590_v8  ;;  %1212 = vmatprep.subr.bf16.mxu0 %v1305_v1  ;;  %v480_v19 = vrot.slane %v475_v10, %v1362_v13  ;;  %v342_v18 = vpack.i.b16 %v210_v12, %v210_v12  ;;  %v186_v20 = vpack.i.b16 %v154_v24, %v154_v24  ;;  %v1278_v10 = vld [vmem:[%s1640_s4 + $0x18] sm:$0xff]   ;;  %v1279_v12 = vld [vmem:[%s1639_s3] sm:$0xff]  }
  0x31   :  { %v1142_v25 = vcombine.low %v571_v9, %v572_v15  ;;  %v587_v26 = vmul.bf16 %v555_v57, %v473_v16  ;;  %v349_v31 = vpack.i.b16 %v214_v23, %v214_v23  ;;  %v274_v33 = vrot.slane %v1133_v11, %v1362_v13  ;;  %v1277_v9 = vld [vmem:[%s1640_s4 + $0x8] sm:$0xff]   ;;  %v1280_v15 = vld [vmem:[%s1639_s3 + $0x10] sm:$0xff]   ;;  %v1056_v23 = vld [vmem:[%s1641_s5] sm:$0xff] }
  0x32   :  { %1231 = vmatpush3.bf16.msra.mxu1 %v1151_v14  ;;  %v588_v34 = vmul.bf16 %v556_v0, %v480_v19  ;;  %v347_v35 = vrot.slane %v342_v18, %v1362_v13  ;;  %v278_v7 = vrot.slane %v186_v20, %v1362_v13  ;;  %v1124_v24 = vpack.i.b16 %v1387_v21, %v1387_v21  ;;  %v1058_v16 = vld [vmem:[%s1641_s5 + $0x10] sm:$0xff]  ;;  %v1059_v14 = vld [vmem:[%s1641_s5 + $0x18] sm:$0xff]  ;;  %v1057_v19 = vld [vmem:[%s1641_s5 + $0x8] sm:$0xff] }
  0x33   :  { %1232 = vmatprep.subr.bf16.mxu1 %v1305_v1  ;;  %1213 = vmatpush3.bf16.msra.mxu0 %v1142_v25  ;;  %v354_v37 = vrot.slane %v349_v31, %v1362_v13  ;;  %v454_v38 = vpack.i.b16 %v274_v33, %v274_v33  ;;  %v168_v39 = vpack.i.b16 %v136_v61, %v136_v61  ;;  %vm805_vm1 = vcmask 130048  }
  0x34   :  { %v1150_v27 = vcombine.low %v587_v26, %v588_v34  ;;  %1214 = vmatprep.subr.bf16.mxu0 %v1305_v1  ;;  %v569_v40 = vmul.bf16 %v553_v32, %v347_v35  ;;  %v461_v28 = vpack.i.b16 %v278_v7, %v278_v7  ;;  %v202_v29 = vrot.slane %v1124_v24, %v1362_v13  ;;  %v1281_v35 = vld [vmem:[%s1639_s3 + $0x8] sm:$0xff]   ;;  %v1282_v24 = vld [vmem:[%s1639_s3 + $0x18] sm:$0xff]   ;;  %s1309_s3 = smov [#allocation2]  }
  0x35   :  { %v570_v30 = vmul.bf16 %v554_v36, %v354_v37  ;;  %v459_v41 = vrot.slane %v454_v38, %v1362_v13  ;;  %v206_v42 = vrot.slane %v168_v39, %v1362_v13  ;;  %v1132_v43 = vpack.i.b16 %v1391_v22, %v1391_v22  ;;  %v552_v22 = vld [vmem:[%s1638_s2 + $0x4] sm:$0xf]  ;;  %s1109_s2 = sshll.u32 %s1309_s3, 4  ;;  %s1110_s2 = int_to_ptr.vmem [resolvable:$true] %s1109_s2 }
  0x36   :  { %1233 = vmatpush3.bf16.msra.mxu1 %v1150_v27  ;;  %v466_v21 = vrot.slane %v461_v28, %v1362_v13  ;;  %v328_v44 = vpack.i.b16 %v202_v29, %v202_v29  ;;  %v184_v61 = vpack.i.b16 %v152_v47, %v152_v47  ;;  %v29_v3 = vpack.c.bf16 %v26_v60, %v25_v59  ;;  %s1283_s14 = scalar_lea.vmem %s1110_s2, 1024  ;;  %p1288_p1 = scmp.lt.s32.totalorder %s1110_s2, %s1110_s2 }
  0x37   :  { %1234 = vmatprep.subr.bf16.mxu1 %v1305_v1  ;;  %v1141_v45 = vcombine.low %v569_v40, %v570_v30  ;;  %v585_v46 = vmul.bf16 %v553_v32, %v459_v41  ;;  %v335_v48 = vpack.i.b16 %v206_v42, %v206_v42  ;;  %v266_v49 = vrot.slane %v1132_v43, %v1362_v13  ;;  %p1284_p0 = scmp.ne.s32.totalorder %s1110_s2, %s1283_s14  ;;  %p1289_p2 = scmp.lt.s32.totalorder %s1283_s14, %s1283_s14 }
  0x38   :  { %v586_v50 = vmul.bf16 %v554_v36, %v466_v21  ;;  %v333_v51 = vrot.slane %v328_v44, %v1362_v13  ;;  %v270_v47 = vrot.slane %v184_v61, %v1362_v13  ;;  %v30_v8 = vpack.c.bf16 %v28_v5, %v27_v4 }
  0x39   :  { %1215 = vmatpush3.bf16.msra.mxu0 %v1141_v45  ;;  %v340_v52 = vrot.slane %v335_v48, %v1362_v13  ;;  %v440_v53 = vpack.i.b16 %v266_v49, %v266_v49  ;;  %v1308_v11 = vmov 0   ;;  %p1290_p3 = por %p1289_p2, %p1288_p1 }
  0x3a   :  { %v1149_v54 = vcombine.low %v585_v46, %v586_v50  ;;  %1216 = vmatprep.subr.bf16.mxu0 %v1305_v1  ;;  %v567_v55 = vmul.bf16 %v551_v17, %v333_v51  ;;  %v447_v56 = vpack.i.b16 %v270_v47, %v270_v47  ;;  %1274 = vset.pattern.permute.xlu1 %v1308_v11 }
  0x3b   :  { %v568_v57 = vmul.bf16 %v552_v22, %v340_v52  ;;  %v445_v58 = vrot.slane %v440_v53, %v1362_v13  ;;  %1273 = vset.pattern.permute.xlu0 %v1308_v11  ;;  %1072 = vperm.xlu1 %1274, %v1058_v16   ;;  %p1291_p4 = pnand %p1290_p3, %p1284_p0 }
  0x3c   :  { %1235 = vmatpush3.bf16.msra.mxu1 %v1149_v54  ;;  %v452_v62 = vrot.slane %v447_v56, %v1362_v13  ;;  %v1276_v13 = vld [vmem:[%s1640_s4 + $0x10] sm:$0xff]   ;;  %1062 = vperm.xlu0 %1273, %v1056_v23  }
  0x3d   :  { %1236 = vmatprep.subr.bf16.mxu1 %v1305_v1  ;;  %v1140_v63 = vcombine.low %v567_v55, %v568_v57  ;;  %v583_v0 = vmul.bf16 %v551_v17, %v445_v58  ;;  %v1275_v1 = vld [vmem:[%s1640_s4] sm:$0xff]  }
  0x3e   :  { %v584_v2 = vmul.bf16 %v552_v22, %v452_v62 }
  0x3f   :  { %1217 = vmatpush3.bf16.msra.mxu0 %v1140_v63  ;;  %1077 = vperm.xlu1 %1274, %v1059_v14  }
  0x40   :  { %v1148_v6 = vcombine.low %v583_v0, %v584_v2  ;;  %1242 = vmatprep.subr.bf16.mxu0 %v29_v3  ;;  %1067 = vperm.xlu0 %1273, %v1057_v19  }
  0x42   :  { %1237 = vmatpush3.bf16.msra.mxu1 %v1148_v6  ;;  %1219 = vmatmul.mubr.bf16.vlgmr.msra.gmra.mxu0 %v29_v3 }
  0x43   :  { %1248 = vmatprep.subr.bf16.mxu1 %v30_v8  ;;  %1243 = vmatpush3.bf16.msra.mxu0 %v29_v3 }
  0x44   :  { %1244 = vmatprep.mubr.msk.bf16.mxu0 %vm805_vm1, %v1275_v1 }
  0x45   :  { %1239 = vmatmul.mubr.bf16.vlgmr.msra.gmra.mxu1 %v30_v8 }
  0x46   :  { %1249 = vmatpush3.bf16.msra.mxu1 %v30_v8  ;;  %1250 = vmatprep.mubr.msk.bf16.mxu1 %vm805_vm1, %v1276_v13 }
  0x4a   :  { %1245 = vmatmul.mubr.msk.bf16.vlgmr.msra.gmra.mxu0 %vm805_vm1, %v1277_v9 }
  0x4b   :  { %1256 = vmatprep.mubr.msk.bf16.mxu0 %vm805_vm1, %v1279_v12 }
  0x4d   :  { %1251 = vmatmul.mubr.msk.bf16.vlgmr.msra.gmra.mxu1 %vm805_vm1, %v1278_v10 }
  0x4e   :  { %1262 = vmatprep.mubr.msk.bf16.mxu1 %vm805_vm1, %v1280_v15 }
  0xb6   :  { %v1073_v41 = vpop.permute.xlu1 %1072 }
  0xb7   :  { %v1063_v44 = vpop.permute.xlu0 %1062 }
  0xba   :  { %v1078_v53 = vpop.permute.xlu1 %1077 }
  0xbb   :  { %v1068_v63 = vpop.permute.xlu0 %1067 }
 0x102   :  { %v681_v18 = vpop.f32.mrf.mxu0 }
 0x104   :  { %v1220_v20 = vpop.f32.mrf.mxu0 }
 0x105   :  { %v770_v25 = vpop.f32.mrf.mxu1 }
 0x106   :  { %v684_v26 = vpop.f32.mrf.mxu0 }
 0x107   :  { %v1240_v31 = vpop.f32.mrf.mxu1  ;;  %v785_v32 = vpack.c.bf16 %v684_v26, %v681_v18 }
 0x108   :  { %v1221_v33 = vpop.f32.mrf.mxu0 }
 0x109   :  { %v773_v34 = vpop.f32.mrf.mxu1  ;;  %1254 = vmatprep.subr.bf16.mxu0 %v785_v32 }
 0x10a   :  { %v786_v36 = vpack.c.bf16 %v773_v34, %v770_v25  ;;  %1255 = vmatpush3.bf16.msra.mxu0 %v785_v32  ;;  %v1246_v37 = vpop.f32.mrf.mxu0 }
 0x10b   :  { %v1241_v7 = vpop.f32.mrf.mxu1 }
 0x10c   :  { %1260 = vmatprep.subr.bf16.mxu1 %v786_v36  ;;  %v846_v39 = vpop.f32.mrf.mxu0 }
 0x10d   :  { %1261 = vmatpush3.bf16.msra.mxu1 %v786_v36  ;;  %1257 = vmatmul.mubr.msk.bf16.vlgmr.msra.gmra.mxu0 %vm805_vm1, %v1281_v35  ;;  %v1252_v38 = vpop.f32.mrf.mxu1 }
 0x10e   :  { %v1247_v40 = vpop.f32.mrf.mxu0 }
 0x10f   :  { %v911_v27 = vpop.f32.mrf.mxu1 }
 0x110   :  { %1263 = vmatmul.mubr.msk.bf16.vlgmr.msra.gmra.mxu1 %vm805_vm1, %v1282_v24  ;;  %v849_v29 = vpop.f32.mrf.mxu0 }
 0x111   :  { %v1253_v28 = vpop.f32.mrf.mxu1 }
 0x113   :  { %v914_v42 = vpop.f32.mrf.mxu1 }
 0x1cd   :  { %v1258_v30 = vpop.f32.mrf.mxu0 }
 0x1ce   :  { %v985_v43 = vadd.f32 %v1258_v30, %v1246_v37 }
 0x1cf   :  { %v976_v21 = vpop.f32.mrf.mxu0 }
 0x1d0   :  { %v1264_v61 = vpop.f32.mrf.mxu1  ;;  %v1082_v45 = vadd.f32 %v1073_v41, %v985_v43  ;;  %v977_v46 = vadd.f32 %v976_v21, %v846_v39 }
 0x1d1   :  { %v1050_v48 = vadd.f32 %v1264_v61, %v1252_v38  ;;  %v1259_v17 = vpop.f32.mrf.mxu0 }
 0x1d2   :  { %v1090_v49 = vmax.f32 %v1082_v45, 0.0  ;;  %v1041_v50 = vpop.f32.mrf.mxu1  ;;  %v1080_v51 = vadd.f32 %v1063_v44, %v977_v46  ;;  %v988_v22 = vadd.f32 %v1259_v17, %v1247_v40 }
 0x1d3   :  { %v1086_v47 = vadd.f32 %v1073_v41, %v1050_v48  ;;  %v1042_v52 = vadd.f32 %v1041_v50, %v911_v27  ;;  %v979_v54 = vpop.f32.mrf.mxu0 }
 0x1d4   :  { %1098 = vst [vmem:[#allocation2 + $0x10] sm:$0xff] %v1090_v49  ;;  %v1088_v55 = vmax.f32 %v1080_v51, 0.0  ;;  %v1265_v56 = vpop.f32.mrf.mxu1  ;;  %v1083_v57 = vadd.f32 %v1078_v53, %v988_v22  ;;  %v980_v58 = vadd.f32 %v979_v54, %v849_v29 }
 0x1d5   :  { %v1094_v59 = vmax.f32 %v1086_v47, 0.0  ;;  %v1084_v60 = vadd.f32 %v1063_v44, %v1042_v52  ;;  %v1053_v62 = vadd.f32 %v1265_v56, %v1253_v28 }
 0x1d6   :  { %1096 = vst [vmem:[#allocation2] sm:$0xff] %v1088_v55  ;;  %v1091_v0 = vmax.f32 %v1083_v57, 0.0  ;;  %v1044_v2 = vpop.f32.mrf.mxu1  ;;  %v1081_v3 = vadd.f32 %v1068_v63, %v980_v58 }
 0x1d7   :  { %1102 = vst [vmem:[#allocation2 + $0x30] sm:$0xff] %v1094_v59  ;;  %v1092_v4 = vmax.f32 %v1084_v60, 0.0  ;;  %v1087_v5 = vadd.f32 %v1078_v53, %v1053_v62  ;;  %v1045_v6 = vadd.f32 %v1044_v2, %v914_v42 }
 0x1d8   :  { %1099 = vst [vmem:[#allocation2 + $0x18] sm:$0xff] %v1091_v0  ;;  %v1089_v8 = vmax.f32 %v1081_v3, 0.0 }
 0x1d9   :  { %1100 = vst [vmem:[#allocation2 + $0x20] sm:$0xff] %v1092_v4  ;;  %v1095_v1 = vmax.f32 %v1087_v5, 0.0  ;;  %v1085_v13 = vadd.f32 %v1068_v63, %v1045_v6 }
 0x1da   :  { %1097 = vst [vmem:[#allocation2 + $0x8] sm:$0xff] %v1089_v8 }
 0x1db   :  { %1103 = vst [vmem:[#allocation2 + $0x38] sm:$0xff] %v1095_v1  ;;  %v1093_v9 = vmax.f32 %v1085_v13, 0.0 }
 0x1dd   :  { %1101 = vst [vmem:[#allocation2 + $0x28] sm:$0xff] %v1093_v9 }
 0x1de   :  { %1294 = shalt.err (!%p1291_p4)
}
 0x1df   :  { %s1310_s15 = smov 128   ;;  %s1311_s16 = smov 8  }
 0x1e0   :  { %1115 = dma.vmem_to_hbm [thread:$0]  %s1110_s2, 1024, %s1642_s6, [#allocation3], %s1310_s15, %s1310_s15, %s1311_s16  }
 0x1e1   :  { %1303 = dma.done.wait [#allocation3], 1024  }
 0x1e2   :  { %1304 = vsyncadd [#allocation3], 4294966272 }
 0x1e3   :  { %1119 = vsyncpa [#allocation3], 1 }

</bundles_post_ra>
